<compile_context>
chip_gen: v5e
topology: v5e:2x2
jax: 0.10.0
libtpu: 0.0.40
codegen_flags: <defaults>
</compile_context>

<pallas_src>
import jax
import jax.numpy as jnp
import numpy as np
from jax.experimental import pallas as pl
from jax.experimental.pallas import tpu as pltpu

NEG_INF = -1e30     # max-pool padding; safe because inputs live in [0, 1]
LOG_CLAMP = -100.0  # nn.BCELoss clamps log() outputs at -100


def _chain_shifts(radius):
    """Shift amounts of a log-depth running max covering offsets [0, radius]."""
    shifts, cover = [], 1
    while cover < radius + 1:
        s = min(cover, radius + 1 - cover)
        shifts.append(s)
        cover += s
    return shifts  # radius=5 -> [1, 2, 2]


def _vmem_capacity_bytes():
    """Best-effort physical VMEM query (v7x: 64 MiB, v5e/v6e: 128 MiB)."""
    get_info = getattr(pltpu, "get_tpu_info", None)
    if get_info is not None:
        try:
            info = get_info()
            for attr in ("vmem_capacity_bytes", "vmem_size_bytes", "vmem_bytes"):
                v = getattr(info, attr, None)
                if v:
                    return int(v)
        except Exception:
            pass
    return 64 * 1024 * 1024  # conservative default (v7x-sized)


def wh_loss(output, target, kernel=11):
    """Pallas TPU implementation of WHLoss.forward (output/target: (B,C,H,W))."""
    assert output.shape == target.shape and output.ndim == 4
    B, C, H, W = output.shape
    N = B * C
    radius = (kernel - 1) // 2
    chain = _chain_shifts(radius) if radius > 0 else []
    max_s = max(chain) if chain else 0
    if chain:
        assert H > 2 * max_s and W > 2 * max_s, "heatmap too small for this pool kernel"

    # ---- lane-pack LP images side by side so small W fills the 128 lanes ----
    LP = max(1, 128 // W) if W <= 128 else 1
    LW = LP * W
    rows = -(-N // LP)                      # packed rows needed for real data

    # ---- grid sizing: padding decouples block size / core split from N ----
    P = 2 if rows >= 2 else 1               # 2-way "parallel" split for v7x's 2 TCs
    rows_per_core = -(-rows // P)
    bytes_per_row = H * LW * 4
    if _vmem_capacity_bytes() >= 96 * 1024 * 1024:   # v5e / v6e (128 MiB VMEM)
        block_budget, vmem_limit = 8 << 20, 64 << 20
    else:                                            # v7x (64 MiB VMEM)
        block_budget, vmem_limit = 4 << 20, 40 << 20
    G = max(1, min(rows_per_core, block_budget // bytes_per_row))
    inner = -(-rows_per_core // G)
    rows_pad = P * inner * G
    N_pad = rows_pad * LP

    # ---- pack / pad.  Padded images are all-zero: they contribute exactly 0
    # to the BCE sum and exactly H*W each to the peak count (subtracted below).
    def _pack(a):
        a = a.astype(jnp.float32).reshape(N, H, W)
        if N_pad > N:
            a = jnp.concatenate(
                [a, jnp.zeros((N_pad - N, H, W), jnp.float32)], axis=0)
        a = a.reshape(rows_pad, LP, H, W).transpose(0, 2, 1, 3)
        return a.reshape(rows_pad, H, LW)

    o = _pack(output)
    t = _pack(target)

    # one additive (0 / NEG_INF) validity plane per (axis, signed shift)
    mask_slot = {}
    for axis in (0, 1):
        for s in sorted(set(chain)):
            for sp in (s, -s):
                mask_slot[(axis, sp)] = len(mask_slot)
    n_masks = max(1, len(mask_slot))
    unroll = min(4, G)

    def kernel_fn(x_ref, t_ref, bce_ref, cnt_ref, mask_ref, acc_bce, acc_cnt):
        i = pl.program_id(1)

        def _roll(v, sp, axis):
            # canonicalize to a non-negative rotate amount
            return pltpu.roll(v, sp % v.shape[axis], axis)

        # Once per core (and per value of the leading 'parallel' axis p):
        # zero the accumulators and build the roll-boundary masks.
        # NOTE: the `i == 0` re-init is what keeps accumulation correct for
        # every p; do not reorder grid axes without revisiting this.
        @pl.when(i == 0)
        def _init():
            acc_bce[...] = jnp.zeros_like(acc_bce)
            acc_cnt[...] = jnp.zeros_like(acc_cnt)
            if chain:
                lane = jax.lax.broadcasted_iota(
                    jnp.int32, (H, LW), 1).astype(jnp.float32)
                row = jax.lax.broadcasted_iota(
                    jnp.int32, (H, LW), 0).astype(jnp.float32)
                col = lane
                for _ in range(LP - 1):   # local column within each packed image
                    col = jnp.where(col >= W, col - W, col)
                for (axis, sp), slot in mask_slot.items():
                    idx = row if axis == 0 else col
                    # Data that legitimately moved by exactly |sp| positions
                    # (no wrap, no crossing a packed-image edge) has an index
                    # difference of exactly +/-|sp|.  Derived from the SAME
                    # roll call as the data path -> roll-direction agnostic.
                    d = _roll(idx, sp, axis) - idx
                    s = float(abs(sp))
                    valid = (d == s) | (d == -s)
                    mask_ref[slot] = jnp.where(valid, 0.0, NEG_INF)

        def pool_1d(v, axis):
            # centered (2*radius+1)-wide running max: two log-depth one-sided
            # chains; invalid (edge / cross-image) contributions are pushed to
            # NEG_INF by the precomputed additive mask planes.
            fwd, bwd = v, v
            for s in chain:
                fwd = jnp.maximum(
                    fwd, _roll(fwd, -s, axis) + mask_ref[mask_slot[(axis, -s)]])
                bwd = jnp.maximum(
                    bwd, _roll(bwd, s, axis) + mask_ref[mask_slot[(axis, s)]])
            return jnp.maximum(fwd, bwd)

        def body(g, carry):
            bce_acc, cnt_acc = carry
            x = x_ref[g]                     # (H, LW) float32
            tg = t_ref[g]
            hmax = pool_1d(pool_1d(x, 1), 0) if chain else x
            peak = (hmax == x).astype(jnp.float32)
            # BCE with nn.BCELoss's -100 log clamp; peak*(...) keeps masked-out
            # pixels at exactly 0 (identical to BCE(x*mask, t*mask)).
            log_x = jnp.maximum(jnp.log(x), LOG_CLAMP)
            log_1mx = jnp.maximum(jnp.log(1.0 - x), LOG_CLAMP)
            bce = peak * -(log_1mx + tg * (log_x - log_1mx))
            return bce_acc + bce, cnt_acc + peak

        zero = jnp.zeros((H, LW), jnp.float32)
        bce_blk, cnt_blk = jax.lax.fori_loop(0, G, body, (zero, zero),
                                             unroll=unroll)
        acc_bce[...] += bce_blk
        acc_cnt[...] += cnt_blk

        # deferred reduction: one cross-lane sum per output, on the last step
        @pl.when(i == pl.num_programs(1) - 1)
        def _finalize():
            bce_ref[...] = jnp.zeros((1, 8, 128), jnp.float32) + jnp.sum(acc_bce[...])
            cnt_ref[...] = jnp.zeros((1, 8, 128), jnp.float32) + jnp.sum(acc_cnt[...])

    bce_parts, cnt_parts = pl.pallas_call(
        kernel_fn,
        out_shape=(jax.ShapeDtypeStruct((P, 8, 128), jnp.float32),
                   jax.ShapeDtypeStruct((P, 8, 128), jnp.float32)),
        grid_spec=pltpu.PrefetchScalarGridSpec(
            num_scalar_prefetch=0,
            grid=(P, inner),
            in_specs=[
                pl.BlockSpec((G, H, LW), lambda p, i: (p * inner + i, 0, 0)),
                pl.BlockSpec((G, H, LW), lambda p, i: (p * inner + i, 0, 0)),
            ],
            out_specs=[
                pl.BlockSpec((1, 8, 128), lambda p, i: (p, 0, 0)),
                pl.BlockSpec((1, 8, 128), lambda p, i: (p, 0, 0)),
            ],
            scratch_shapes=[pltpu.VMEM((n_masks, H, LW), jnp.float32),
                            pltpu.VMEM((H, LW), jnp.float32),
                            pltpu.VMEM((H, LW), jnp.float32)],
        ),
        compiler_params=pltpu.CompilerParams(
            dimension_semantics=("parallel", "arbitrary"),
            vmem_limit_bytes=vmem_limit,
        ),
    )(o, t)

    bce_total = jnp.sum(bce_parts[:, 0, 0])
    # padded all-zero images contribute 0 BCE and H*W peaks each — remove them
    cnt_total = jnp.sum(cnt_parts[:, 0, 0]) - float((N_pad - N) * H * W)
    return bce_total / cnt_total


def _wh_loss_reference(output, target, kernel=11):
    """Pure-JAX re-implementation of the PyTorch WHLoss module (for checking)."""
    pad = (kernel - 1) // 2
    hmax = jax.lax.reduce_window(
        output, -jnp.inf, jax.lax.max,
        window_dimensions=(1, 1, kernel, kernel),
        window_strides=(1, 1, 1, 1),
        padding=((0, 0), (0, 0), (pad, pad), (pad, pad)))
    mask = (hmax == output).astype(jnp.float32)
    p = output * mask
    tm = target * mask
    bce = -(tm * jnp.maximum(jnp.log(p), LOG_CLAMP)
            + (1.0 - tm) * jnp.maximum(jnp.log(1.0 - p), LOG_CLAMP))
    return jnp.sum(bce) / jnp.sum(mask)


if __name__ == "__main__":
    key = jax.random.PRNGKey(0)
    k1, k2 = jax.random.split(key)
    # output: probabilities in (0, 1) (nn.BCELoss requirement); target in [0, 1]
    output = jax.nn.sigmoid(jax.random.normal(k1, (2, 4, 16, 16), jnp.float32))
    target = jax.random.uniform(k2, (2, 4, 16, 16), dtype=jnp.float32)

    loss = wh_loss(output, target)
    jax.block_until_ready(loss)

    ref = _wh_loss_reference(output, target)
    np.testing.assert_allclose(np.asarray(loss), np.asarray(ref),
                               rtol=1e-5, atol=1e-5)

    print("KERNEL_OK")
</pallas_src>

<mosaic_0001>
module attributes {stable_mosaic.version = 11 : i64} {
  func.func @kernel_fn(%arg0: i32, %arg1: i32, %arg2: memref<1x16x128xf32, #tpu.memory_space<vmem>>, %arg3: memref<1x16x128xf32, #tpu.memory_space<vmem>>, %arg4: memref<1x8x128xf32, #tpu.memory_space<vmem>>, %arg5: memref<1x8x128xf32, #tpu.memory_space<vmem>>, %arg6: memref<8x16x128xf32, #tpu.memory_space<vmem>>, %arg7: memref<16x128xf32, #tpu.memory_space<vmem>>, %arg8: memref<16x128xf32, #tpu.memory_space<vmem>>) attributes {dimension_semantics = [#tpu.dimension_semantics<parallel>, #tpu.dimension_semantics<arbitrary>], iteration_bounds = array<i64: 1, 1>, scalar_prefetch = 0 : i64, scratch_operands = 3 : i64, tpu.core_type = #tpu.core_type<tc>, window_params = [{transform_indices = @transform_0, window_bounds = array<i64: 1, 16, 128>}, {transform_indices = @transform_1, window_bounds = array<i64: 1, 16, 128>}, {transform_indices = @transform_2, window_bounds = array<i64: 1, 8, 128>}, {transform_indices = @transform_3, window_bounds = array<i64: 1, 8, 128>}]} {
    %c0_i32 = arith.constant 0 : i32
    %0 = arith.cmpi eq, %arg1, %c0_i32 : i32
    %1 = arith.extui %0 : i1 to i32
    %c0_i32_0 = arith.constant 0 : i32
    %2 = arith.cmpi ne, %1, %c0_i32_0 : i32
    scf.if %2 {
      %cst_55 = arith.constant 0.000000e+00 : f32
      %100 = vector.broadcast %cst_55 : f32 to vector<16x128xf32>
      %c0_56 = arith.constant 0 : index
      %c0_57 = arith.constant 0 : index
      %101 = vector.load %arg7[%c0_56, %c0_57] : memref<16x128xf32, #tpu.memory_space<vmem>>, vector<16x128xf32>
      tpu.vector_store %arg7[%c0_56, %c0_57], %100 {strides = array<i32>} : memref<16x128xf32, #tpu.memory_space<vmem>>, vector<16x128xf32>,
      %cst_58 = arith.constant 0.000000e+00 : f32
      %102 = vector.broadcast %cst_58 : f32 to vector<16x128xf32>
      %c0_59 = arith.constant 0 : index
      %c0_60 = arith.constant 0 : index
      %103 = vector.load %arg8[%c0_59, %c0_60] : memref<16x128xf32, #tpu.memory_space<vmem>>, vector<16x128xf32>
      tpu.vector_store %arg8[%c0_59, %c0_60], %102 {strides = array<i32>} : memref<16x128xf32, #tpu.memory_space<vmem>>, vector<16x128xf32>,
      %104 = tpu.iota {dimensions = array<i32: 1>} : vector<16x128xi32>
      %105 = arith.sitofp %104 : vector<16x128xi32> to vector<16x128xf32>
      %106 = tpu.iota {dimensions = array<i32: 0>} : vector<16x128xi32>
      %107 = arith.sitofp %106 : vector<16x128xi32> to vector<16x128xf32>
      %cst_61 = arith.constant 1.600000e+01 : f32
      %108 = vector.broadcast %cst_61 : f32 to vector<16x128xf32>
      %109 = arith.cmpf oge, %105, %108 : vector<16x128xf32>
      %cst_62 = arith.constant 1.600000e+01 : f32
      %110 = vector.broadcast %cst_62 : f32 to vector<16x128xf32>
      %111 = arith.subf %105, %110 : vector<16x128xf32>
      %112 = arith.select %109, %111, %105 : vector<16x128xi1>, vector<16x128xf32>
      %cst_63 = arith.constant 1.600000e+01 : f32
      %113 = vector.broadcast %cst_63 : f32 to vector<16x128xf32>
      %114 = arith.cmpf oge, %112, %113 : vector<16x128xf32>
      %cst_64 = arith.constant 1.600000e+01 : f32
      %115 = vector.broadcast %cst_64 : f32 to vector<16x128xf32>
      %116 = arith.subf %112, %115 : vector<16x128xf32>
      %117 = arith.select %114, %116, %112 : vector<16x128xi1>, vector<16x128xf32>
      %cst_65 = arith.constant 1.600000e+01 : f32
      %118 = vector.broadcast %cst_65 : f32 to vector<16x128xf32>
      %119 = arith.cmpf oge, %117, %118 : vector<16x128xf32>
      %cst_66 = arith.constant 1.600000e+01 : f32
      %120 = vector.broadcast %cst_66 : f32 to vector<16x128xf32>
      %121 = arith.subf %117, %120 : vector<16x128xf32>
      %122 = arith.select %119, %121, %117 : vector<16x128xi1>, vector<16x128xf32>
      %cst_67 = arith.constant 1.600000e+01 : f32
      %123 = vector.broadcast %cst_67 : f32 to vector<16x128xf32>
      %124 = arith.cmpf oge, %122, %123 : vector<16x128xf32>
      %cst_68 = arith.constant 1.600000e+01 : f32
      %125 = vector.broadcast %cst_68 : f32 to vector<16x128xf32>
      %126 = arith.subf %122, %125 : vector<16x128xf32>
      %127 = arith.select %124, %126, %122 : vector<16x128xi1>, vector<16x128xf32>
      %cst_69 = arith.constant 1.600000e+01 : f32
      %128 = vector.broadcast %cst_69 : f32 to vector<16x128xf32>
      %129 = arith.cmpf oge, %127, %128 : vector<16x128xf32>
      %cst_70 = arith.constant 1.600000e+01 : f32
      %130 = vector.broadcast %cst_70 : f32 to vector<16x128xf32>
      %131 = arith.subf %127, %130 : vector<16x128xf32>
      %132 = arith.select %129, %131, %127 : vector<16x128xi1>, vector<16x128xf32>
      %cst_71 = arith.constant 1.600000e+01 : f32
      %133 = vector.broadcast %cst_71 : f32 to vector<16x128xf32>
      %134 = arith.cmpf oge, %132, %133 : vector<16x128xf32>
      %cst_72 = arith.constant 1.600000e+01 : f32
      %135 = vector.broadcast %cst_72 : f32 to vector<16x128xf32>
      %136 = arith.subf %132, %135 : vector<16x128xf32>
      %137 = arith.select %134, %136, %132 : vector<16x128xi1>, vector<16x128xf32>
      %cst_73 = arith.constant 1.600000e+01 : f32
      %138 = vector.broadcast %cst_73 : f32 to vector<16x128xf32>
      %139 = arith.cmpf oge, %137, %138 : vector<16x128xf32>
      %cst_74 = arith.constant 1.600000e+01 : f32
      %140 = vector.broadcast %cst_74 : f32 to vector<16x128xf32>
      %141 = arith.subf %137, %140 : vector<16x128xf32>
      %142 = arith.select %139, %141, %137 : vector<16x128xi1>, vector<16x128xf32>
      %c1_i32_75 = arith.constant 1 : i32
      %143 = tpu.dynamic_rotate %107 by %c1_i32_75 dim 0 : vector<16x128xf32>, i32 -> vector<16x128xf32>
      %144 = arith.subf %143, %107 : vector<16x128xf32>
      %cst_76 = arith.constant 1.000000e+00 : f32
      %145 = vector.broadcast %cst_76 : f32 to vector<16x128xf32>
      %146 = arith.cmpf oeq, %144, %145 : vector<16x128xf32>
      %cst_77 = arith.constant -1.000000e+00 : f32
      %147 = vector.broadcast %cst_77 : f32 to vector<16x128xf32>
      %148 = arith.cmpf oeq, %144, %147 : vector<16x128xf32>
      %149 = arith.ori %146, %148 : vector<16x128xi1>
      %cst_78 = arith.constant 0.000000e+00 : f32
      %cst_79 = arith.constant -1.000000e+30 : f32
      %150 = vector.broadcast %cst_78 : f32 to vector<16x128xf32>
      %151 = vector.broadcast %cst_79 : f32 to vector<16x128xf32>
      %152 = arith.select %149, %150, %151 : vector<16x128xi1>, vector<16x128xf32>
      %c0_80 = arith.constant 0 : index
      %c0_81 = arith.constant 0 : index
      %c0_82 = arith.constant 0 : index
      %153 = vector.load %arg6[%c0_80, %c0_81, %c0_82] : memref<8x16x128xf32, #tpu.memory_space<vmem>>, vector<1x16x128xf32>
      %154 = vector.shape_cast %153 : vector<1x16x128xf32> to vector<16x128xf32>
      %155 = vector.shape_cast %152 : vector<16x128xf32> to vector<1x16x128xf32>
      tpu.vector_store %arg6[%c0_80, %c0_81, %c0_82], %155 {strides = array<i32>} : memref<8x16x128xf32, #tpu.memory_space<vmem>>, vector<1x16x128xf32>,
      %c15_i32_83 = arith.constant 15 : i32
      %156 = tpu.dynamic_rotate %107 by %c15_i32_83 dim 0 : vector<16x128xf32>, i32 -> vector<16x128xf32>
      %157 = arith.subf %156, %107 : vector<16x128xf32>
      %cst_84 = arith.constant 1.000000e+00 : f32
      %158 = vector.broadcast %cst_84 : f32 to vector<16x128xf32>
      %159 = arith.cmpf oeq, %157, %158 : vector<16x128xf32>
      %cst_85 = arith.constant -1.000000e+00 : f32
      %160 = vector.broadcast %cst_85 : f32 to vector<16x128xf32>
      %161 = arith.cmpf oeq, %157, %160 : vector<16x128xf32>
      %162 = arith.ori %159, %161 : vector<16x128xi1>
      %cst_86 = arith.constant 0.000000e+00 : f32
      %cst_87 = arith.constant -1.000000e+30 : f32
      %163 = vector.broadcast %cst_86 : f32 to vector<16x128xf32>
      %164 = vector.broadcast %cst_87 : f32 to vector<16x128xf32>
      %165 = arith.select %162, %163, %164 : vector<16x128xi1>, vector<16x128xf32>
      %c1_88 = arith.constant 1 : index
      %c0_89 = arith.constant 0 : index
      %c0_90 = arith.constant 0 : index
      %166 = vector.load %arg6[%c1_88, %c0_89, %c0_90] : memref<8x16x128xf32, #tpu.memory_space<vmem>>, vector<1x16x128xf32>
      %167 = vector.shape_cast %166 : vector<1x16x128xf32> to vector<16x128xf32>
      %168 = vector.shape_cast %165 : vector<16x128xf32> to vector<1x16x128xf32>
      tpu.vector_store %arg6[%c1_88, %c0_89, %c0_90], %168 {strides = array<i32>} : memref<8x16x128xf32, #tpu.memory_space<vmem>>, vector<1x16x128xf32>,
      %c2_i32_91 = arith.constant 2 : i32
      %169 = tpu.dynamic_rotate %107 by %c2_i32_91 dim 0 : vector<16x128xf32>, i32 -> vector<16x128xf32>
      %170 = arith.subf %169, %107 : vector<16x128xf32>
      %cst_92 = arith.constant 2.000000e+00 : f32
      %171 = vector.broadcast %cst_92 : f32 to vector<16x128xf32>
      %172 = arith.cmpf oeq, %170, %171 : vector<16x128xf32>
      %cst_93 = arith.constant -2.000000e+00 : f32
      %173 = vector.broadcast %cst_93 : f32 to vector<16x128xf32>
      %174 = arith.cmpf oeq, %170, %173 : vector<16x128xf32>
      %175 = arith.ori %172, %174 : vector<16x128xi1>
      %cst_94 = arith.constant 0.000000e+00 : f32
      %cst_95 = arith.constant -1.000000e+30 : f32
      %176 = vector.broadcast %cst_94 : f32 to vector<16x128xf32>
      %177 = vector.broadcast %cst_95 : f32 to vector<16x128xf32>
      %178 = arith.select %175, %176, %177 : vector<16x128xi1>, vector<16x128xf32>
      %c2_96 = arith.constant 2 : index
      %c0_97 = arith.constant 0 : index
      %c0_98 = arith.constant 0 : index
      %179 = vector.load %arg6[%c2_96, %c0_97, %c0_98] : memref<8x16x128xf32, #tpu.memory_space<vmem>>, vector<1x16x128xf32>
      %180 = vector.shape_cast %179 : vector<1x16x128xf32> to vector<16x128xf32>
      %181 = vector.shape_cast %178 : vector<16x128xf32> to vector<1x16x128xf32>
      tpu.vector_store %arg6[%c2_96, %c0_97, %c0_98], %181 {strides = array<i32>} : memref<8x16x128xf32, #tpu.memory_space<vmem>>, vector<1x16x128xf32>,
      %c14_i32_99 = arith.constant 14 : i32
      %182 = tpu.dynamic_rotate %107 by %c14_i32_99 dim 0 : vector<16x128xf32>, i32 -> vector<16x128xf32>
      %183 = arith.subf %182, %107 : vector<16x128xf32>
      %cst_100 = arith.constant 2.000000e+00 : f32
      %184 = vector.broadcast %cst_100 : f32 to vector<16x128xf32>
      %185 = arith.cmpf oeq, %183, %184 : vector<16x128xf32>
      %cst_101 = arith.constant -2.000000e+00 : f32
      %186 = vector.broadcast %cst_101 : f32 to vector<16x128xf32>
      %187 = arith.cmpf oeq, %183, %186 : vector<16x128xf32>
      %188 = arith.ori %185, %187 : vector<16x128xi1>
      %cst_102 = arith.constant 0.000000e+00 : f32
      %cst_103 = arith.constant -1.000000e+30 : f32
      %189 = vector.broadcast %cst_102 : f32 to vector<16x128xf32>
      %190 = vector.broadcast %cst_103 : f32 to vector<16x128xf32>
      %191 = arith.select %188, %189, %190 : vector<16x128xi1>, vector<16x128xf32>
      %c3_104 = arith.constant 3 : index
      %c0_105 = arith.constant 0 : index
      %c0_106 = arith.constant 0 : index
      %192 = vector.load %arg6[%c3_104, %c0_105, %c0_106] : memref<8x16x128xf32, #tpu.memory_space<vmem>>, vector<1x16x128xf32>
      %193 = vector.shape_cast %192 : vector<1x16x128xf32> to vector<16x128xf32>
      %194 = vector.shape_cast %191 : vector<16x128xf32> to vector<1x16x128xf32>
      tpu.vector_store %arg6[%c3_104, %c0_105, %c0_106], %194 {strides = array<i32>} : memref<8x16x128xf32, #tpu.memory_space<vmem>>, vector<1x16x128xf32>,
      %c1_i32_107 = arith.constant 1 : i32
      %195 = tpu.dynamic_rotate %142 by %c1_i32_107 dim 1 : vector<16x128xf32>, i32 -> vector<16x128xf32>
      %196 = arith.subf %195, %142 : vector<16x128xf32>
      %cst_108 = arith.constant 1.000000e+00 : f32
      %197 = vector.broadcast %cst_108 : f32 to vector<16x128xf32>
      %198 = arith.cmpf oeq, %196, %197 : vector<16x128xf32>
      %cst_109 = arith.constant -1.000000e+00 : f32
      %199 = vector.broadcast %cst_109 : f32 to vector<16x128xf32>
      %200 = arith.cmpf oeq, %196, %199 : vector<16x128xf32>
      %201 = arith.ori %198, %200 : vector<16x128xi1>
      %cst_110 = arith.constant 0.000000e+00 : f32
      %cst_111 = arith.constant -1.000000e+30 : f32
      %202 = vector.broadcast %cst_110 : f32 to vector<16x128xf32>
      %203 = vector.broadcast %cst_111 : f32 to vector<16x128xf32>
      %204 = arith.select %201, %202, %203 : vector<16x128xi1>, vector<16x128xf32>
      %c4_112 = arith.constant 4 : index
      %c0_113 = arith.constant 0 : index
      %c0_114 = arith.constant 0 : index
      %205 = vector.load %arg6[%c4_112, %c0_113, %c0_114] : memref<8x16x128xf32, #tpu.memory_space<vmem>>, vector<1x16x128xf32>
      %206 = vector.shape_cast %205 : vector<1x16x128xf32> to vector<16x128xf32>
      %207 = vector.shape_cast %204 : vector<16x128xf32> to vector<1x16x128xf32>
      tpu.vector_store %arg6[%c4_112, %c0_113, %c0_114], %207 {strides = array<i32>} : memref<8x16x128xf32, #tpu.memory_space<vmem>>, vector<1x16x128xf32>,
      %c127_i32_115 = arith.constant 127 : i32
      %208 = tpu.dynamic_rotate %142 by %c127_i32_115 dim 1 : vector<16x128xf32>, i32 -> vector<16x128xf32>
      %209 = arith.subf %208, %142 : vector<16x128xf32>
      %cst_116 = arith.constant 1.000000e+00 : f32
      %210 = vector.broadcast %cst_116 : f32 to vector<16x128xf32>
      %211 = arith.cmpf oeq, %209, %210 : vector<16x128xf32>
      %cst_117 = arith.constant -1.000000e+00 : f32
      %212 = vector.broadcast %cst_117 : f32 to vector<16x128xf32>
      %213 = arith.cmpf oeq, %209, %212 : vector<16x128xf32>
      %214 = arith.ori %211, %213 : vector<16x128xi1>
      %cst_118 = arith.constant 0.000000e+00 : f32
      %cst_119 = arith.constant -1.000000e+30 : f32
      %215 = vector.broadcast %cst_118 : f32 to vector<16x128xf32>
      %216 = vector.broadcast %cst_119 : f32 to vector<16x128xf32>
      %217 = arith.select %214, %215, %216 : vector<16x128xi1>, vector<16x128xf32>
      %c5_120 = arith.constant 5 : index
      %c0_121 = arith.constant 0 : index
      %c0_122 = arith.constant 0 : index
      %218 = vector.load %arg6[%c5_120, %c0_121, %c0_122] : memref<8x16x128xf32, #tpu.memory_space<vmem>>, vector<1x16x128xf32>
      %219 = vector.shape_cast %218 : vector<1x16x128xf32> to vector<16x128xf32>
      %220 = vector.shape_cast %217 : vector<16x128xf32> to vector<1x16x128xf32>
      tpu.vector_store %arg6[%c5_120, %c0_121, %c0_122], %220 {strides = array<i32>} : memref<8x16x128xf32, #tpu.memory_space<vmem>>, vector<1x16x128xf32>,
      %c2_i32_123 = arith.constant 2 : i32
      %221 = tpu.dynamic_rotate %142 by %c2_i32_123 dim 1 : vector<16x128xf32>, i32 -> vector<16x128xf32>
      %222 = arith.subf %221, %142 : vector<16x128xf32>
      %cst_124 = arith.constant 2.000000e+00 : f32
      %223 = vector.broadcast %cst_124 : f32 to vector<16x128xf32>
      %224 = arith.cmpf oeq, %222, %223 : vector<16x128xf32>
      %cst_125 = arith.constant -2.000000e+00 : f32
      %225 = vector.broadcast %cst_125 : f32 to vector<16x128xf32>
      %226 = arith.cmpf oeq, %222, %225 : vector<16x128xf32>
      %227 = arith.ori %224, %226 : vector<16x128xi1>
      %cst_126 = arith.constant 0.000000e+00 : f32
      %cst_127 = arith.constant -1.000000e+30 : f32
      %228 = vector.broadcast %cst_126 : f32 to vector<16x128xf32>
      %229 = vector.broadcast %cst_127 : f32 to vector<16x128xf32>
      %230 = arith.select %227, %228, %229 : vector<16x128xi1>, vector<16x128xf32>
      %c6_128 = arith.constant 6 : index
      %c0_129 = arith.constant 0 : index
      %c0_130 = arith.constant 0 : index
      %231 = vector.load %arg6[%c6_128, %c0_129, %c0_130] : memref<8x16x128xf32, #tpu.memory_space<vmem>>, vector<1x16x128xf32>
      %232 = vector.shape_cast %231 : vector<1x16x128xf32> to vector<16x128xf32>
      %233 = vector.shape_cast %230 : vector<16x128xf32> to vector<1x16x128xf32>
      tpu.vector_store %arg6[%c6_128, %c0_129, %c0_130], %233 {strides = array<i32>} : memref<8x16x128xf32, #tpu.memory_space<vmem>>, vector<1x16x128xf32>,
      %c126_i32_131 = arith.constant 126 : i32
      %234 = tpu.dynamic_rotate %142 by %c126_i32_131 dim 1 : vector<16x128xf32>, i32 -> vector<16x128xf32>
      %235 = arith.subf %234, %142 : vector<16x128xf32>
      %cst_132 = arith.constant 2.000000e+00 : f32
      %236 = vector.broadcast %cst_132 : f32 to vector<16x128xf32>
      %237 = arith.cmpf oeq, %235, %236 : vector<16x128xf32>
      %cst_133 = arith.constant -2.000000e+00 : f32
      %238 = vector.broadcast %cst_133 : f32 to vector<16x128xf32>
      %239 = arith.cmpf oeq, %235, %238 : vector<16x128xf32>
      %240 = arith.ori %237, %239 : vector<16x128xi1>
      %cst_134 = arith.constant 0.000000e+00 : f32
      %cst_135 = arith.constant -1.000000e+30 : f32
      %241 = vector.broadcast %cst_134 : f32 to vector<16x128xf32>
      %242 = vector.broadcast %cst_135 : f32 to vector<16x128xf32>
      %243 = arith.select %240, %241, %242 : vector<16x128xi1>, vector<16x128xf32>
      %c7_136 = arith.constant 7 : index
      %c0_137 = arith.constant 0 : index
      %c0_138 = arith.constant 0 : index
      %244 = vector.load %arg6[%c7_136, %c0_137, %c0_138] : memref<8x16x128xf32, #tpu.memory_space<vmem>>, vector<1x16x128xf32>
      %245 = vector.shape_cast %244 : vector<1x16x128xf32> to vector<16x128xf32>
      %246 = vector.shape_cast %243 : vector<16x128xf32> to vector<1x16x128xf32>
      tpu.vector_store %arg6[%c7_136, %c0_137, %c0_138], %246 {strides = array<i32>} : memref<8x16x128xf32, #tpu.memory_space<vmem>>, vector<1x16x128xf32>,
    } else {
    }
    %cst = arith.constant 0.000000e+00 : f32
    %3 = vector.broadcast %cst : f32 to vector<16x128xf32>
    %c0_i32_1 = arith.constant 0 : i32
    %4 = arith.index_cast %c0_i32_1 : i32 to index
    %c0 = arith.constant 0 : index
    %c0_2 = arith.constant 0 : index
    %5 = vector.load %arg2[%4, %c0, %c0_2] : memref<1x16x128xf32, #tpu.memory_space<vmem>>, vector<1x16x128xf32>
    %6 = vector.shape_cast %5 : vector<1x16x128xf32> to vector<16x128xf32>
    %7 = arith.index_cast %c0_i32_1 : i32 to index
    %c0_3 = arith.constant 0 : index
    %c0_4 = arith.constant 0 : index
    %8 = vector.load %arg3[%7, %c0_3, %c0_4] : memref<1x16x128xf32, #tpu.memory_space<vmem>>, vector<1x16x128xf32>
    %9 = vector.shape_cast %8 : vector<1x16x128xf32> to vector<16x128xf32>
    %c127_i32 = arith.constant 127 : i32
    %10 = tpu.dynamic_rotate %6 by %c127_i32 dim 1 : vector<16x128xf32>, i32 -> vector<16x128xf32>
    %c5 = arith.constant 5 : index
    %c0_5 = arith.constant 0 : index
    %c0_6 = arith.constant 0 : index
    %11 = vector.load %arg6[%c5, %c0_5, %c0_6] : memref<8x16x128xf32, #tpu.memory_space<vmem>>, vector<1x16x128xf32>
    %12 = vector.shape_cast %11 : vector<1x16x128xf32> to vector<16x128xf32>
    %13 = arith.addf %10, %12 : vector<16x128xf32>
    %14 = arith.maximumf %6, %13 : vector<16x128xf32>
    %c1_i32 = arith.constant 1 : i32
    %15 = tpu.dynamic_rotate %6 by %c1_i32 dim 1 : vector<16x128xf32>, i32 -> vector<16x128xf32>
    %c4 = arith.constant 4 : index
    %c0_7 = arith.constant 0 : index
    %c0_8 = arith.constant 0 : index
    %16 = vector.load %arg6[%c4, %c0_7, %c0_8] : memref<8x16x128xf32, #tpu.memory_space<vmem>>, vector<1x16x128xf32>
    %17 = vector.shape_cast %16 : vector<1x16x128xf32> to vector<16x128xf32>
    %18 = arith.addf %15, %17 : vector<16x128xf32>
    %19 = arith.maximumf %6, %18 : vector<16x128xf32>
    %c126_i32 = arith.constant 126 : i32
    %20 = tpu.dynamic_rotate %14 by %c126_i32 dim 1 : vector<16x128xf32>, i32 -> vector<16x128xf32>
    %c7 = arith.constant 7 : index
    %c0_9 = arith.constant 0 : index
    %c0_10 = arith.constant 0 : index
    %21 = vector.load %arg6[%c7, %c0_9, %c0_10] : memref<8x16x128xf32, #tpu.memory_space<vmem>>, vector<1x16x128xf32>
    %22 = vector.shape_cast %21 : vector<1x16x128xf32> to vector<16x128xf32>
    %23 = arith.addf %20, %22 : vector<16x128xf32>
    %24 = arith.maximumf %14, %23 : vector<16x128xf32>
    %c2_i32 = arith.constant 2 : i32
    %25 = tpu.dynamic_rotate %19 by %c2_i32 dim 1 : vector<16x128xf32>, i32 -> vector<16x128xf32>
    %c6 = arith.constant 6 : index
    %c0_11 = arith.constant 0 : index
    %c0_12 = arith.constant 0 : index
    %26 = vector.load %arg6[%c6, %c0_11, %c0_12] : memref<8x16x128xf32, #tpu.memory_space<vmem>>, vector<1x16x128xf32>
    %27 = vector.shape_cast %26 : vector<1x16x128xf32> to vector<16x128xf32>
    %28 = arith.addf %25, %27 : vector<16x128xf32>
    %29 = arith.maximumf %19, %28 : vector<16x128xf32>
    %c126_i32_13 = arith.constant 126 : i32
    %30 = tpu.dynamic_rotate %24 by %c126_i32_13 dim 1 : vector<16x128xf32>, i32 -> vector<16x128xf32>
    %c7_14 = arith.constant 7 : index
    %c0_15 = arith.constant 0 : index
    %c0_16 = arith.constant 0 : index
    %31 = vector.load %arg6[%c7_14, %c0_15, %c0_16] : memref<8x16x128xf32, #tpu.memory_space<vmem>>, vector<1x16x128xf32>
    %32 = vector.shape_cast %31 : vector<1x16x128xf32> to vector<16x128xf32>
    %33 = arith.addf %30, %32 : vector<16x128xf32>
    %34 = arith.maximumf %24, %33 : vector<16x128xf32>
    %c2_i32_17 = arith.constant 2 : i32
    %35 = tpu.dynamic_rotate %29 by %c2_i32_17 dim 1 : vector<16x128xf32>, i32 -> vector<16x128xf32>
    %c6_18 = arith.constant 6 : index
    %c0_19 = arith.constant 0 : index
    %c0_20 = arith.constant 0 : index
    %36 = vector.load %arg6[%c6_18, %c0_19, %c0_20] : memref<8x16x128xf32, #tpu.memory_space<vmem>>, vector<1x16x128xf32>
    %37 = vector.shape_cast %36 : vector<1x16x128xf32> to vector<16x128xf32>
    %38 = arith.addf %35, %37 : vector<16x128xf32>
    %39 = arith.maximumf %29, %38 : vector<16x128xf32>
    %40 = arith.maximumf %34, %39 : vector<16x128xf32>
    %c15_i32 = arith.constant 15 : i32
    %41 = tpu.dynamic_rotate %40 by %c15_i32 dim 0 : vector<16x128xf32>, i32 -> vector<16x128xf32>
    %c1 = arith.constant 1 : index
    %c0_21 = arith.constant 0 : index
    %c0_22 = arith.constant 0 : index
    %42 = vector.load %arg6[%c1, %c0_21, %c0_22] : memref<8x16x128xf32, #tpu.memory_space<vmem>>, vector<1x16x128xf32>
    %43 = vector.shape_cast %42 : vector<1x16x128xf32> to vector<16x128xf32>
    %44 = arith.addf %41, %43 : vector<16x128xf32>
    %45 = arith.maximumf %40, %44 : vector<16x128xf32>
    %c1_i32_23 = arith.constant 1 : i32
    %46 = tpu.dynamic_rotate %40 by %c1_i32_23 dim 0 : vector<16x128xf32>, i32 -> vector<16x128xf32>
    %c0_24 = arith.constant 0 : index
    %c0_25 = arith.constant 0 : index
    %c0_26 = arith.constant 0 : index
    %47 = vector.load %arg6[%c0_24, %c0_25, %c0_26] : memref<8x16x128xf32, #tpu.memory_space<vmem>>, vector<1x16x128xf32>
    %48 = vector.shape_cast %47 : vector<1x16x128xf32> to vector<16x128xf32>
    %49 = arith.addf %46, %48 : vector<16x128xf32>
    %50 = arith.maximumf %40, %49 : vector<16x128xf32>
    %c14_i32 = arith.constant 14 : i32
    %51 = tpu.dynamic_rotate %45 by %c14_i32 dim 0 : vector<16x128xf32>, i32 -> vector<16x128xf32>
    %c3 = arith.constant 3 : index
    %c0_27 = arith.constant 0 : index
    %c0_28 = arith.constant 0 : index
    %52 = vector.load %arg6[%c3, %c0_27, %c0_28] : memref<8x16x128xf32, #tpu.memory_space<vmem>>, vector<1x16x128xf32>
    %53 = vector.shape_cast %52 : vector<1x16x128xf32> to vector<16x128xf32>
    %54 = arith.addf %51, %53 : vector<16x128xf32>
    %55 = arith.maximumf %45, %54 : vector<16x128xf32>
    %c2_i32_29 = arith.constant 2 : i32
    %56 = tpu.dynamic_rotate %50 by %c2_i32_29 dim 0 : vector<16x128xf32>, i32 -> vector<16x128xf32>
    %c2 = arith.constant 2 : index
    %c0_30 = arith.constant 0 : index
    %c0_31 = arith.constant 0 : index
    %57 = vector.load %arg6[%c2, %c0_30, %c0_31] : memref<8x16x128xf32, #tpu.memory_space<vmem>>, vector<1x16x128xf32>
    %58 = vector.shape_cast %57 : vector<1x16x128xf32> to vector<16x128xf32>
    %59 = arith.addf %56, %58 : vector<16x128xf32>
    %60 = arith.maximumf %50, %59 : vector<16x128xf32>
    %c14_i32_32 = arith.constant 14 : i32
    %61 = tpu.dynamic_rotate %55 by %c14_i32_32 dim 0 : vector<16x128xf32>, i32 -> vector<16x128xf32>
    %c3_33 = arith.constant 3 : index
    %c0_34 = arith.constant 0 : index
    %c0_35 = arith.constant 0 : index
    %62 = vector.load %arg6[%c3_33, %c0_34, %c0_35] : memref<8x16x128xf32, #tpu.memory_space<vmem>>, vector<1x16x128xf32>
    %63 = vector.shape_cast %62 : vector<1x16x128xf32> to vector<16x128xf32>
    %64 = arith.addf %61, %63 : vector<16x128xf32>
    %65 = arith.maximumf %55, %64 : vector<16x128xf32>
    %c2_i32_36 = arith.constant 2 : i32
    %66 = tpu.dynamic_rotate %60 by %c2_i32_36 dim 0 : vector<16x128xf32>, i32 -> vector<16x128xf32>
    %c2_37 = arith.constant 2 : index
    %c0_38 = arith.constant 0 : index
    %c0_39 = arith.constant 0 : index
    %67 = vector.load %arg6[%c2_37, %c0_38, %c0_39] : memref<8x16x128xf32, #tpu.memory_space<vmem>>, vector<1x16x128xf32>
    %68 = vector.shape_cast %67 : vector<1x16x128xf32> to vector<16x128xf32>
    %69 = arith.addf %66, %68 : vector<16x128xf32>
    %70 = arith.maximumf %60, %69 : vector<16x128xf32>
    %71 = arith.maximumf %65, %70 : vector<16x128xf32>
    %72 = arith.cmpf oeq, %71, %6 : vector<16x128xf32>
    %73 = arith.extui %72 : vector<16x128xi1> to vector<16x128xi32>
    %74 = arith.sitofp %73 : vector<16x128xi32> to vector<16x128xf32>
    %75 = math.log %6 : vector<16x128xf32>
    %cst_40 = arith.constant -1.000000e+02 : f32
    %76 = vector.broadcast %cst_40 : f32 to vector<16x128xf32>
    %77 = arith.maximumf %75, %76 : vector<16x128xf32>
    %cst_41 = arith.constant 1.000000e+00 : f32
    %78 = vector.broadcast %cst_41 : f32 to vector<16x128xf32>
    %79 = arith.subf %78, %6 : vector<16x128xf32>
    %80 = math.log %79 : vector<16x128xf32>
    %cst_42 = arith.constant -1.000000e+02 : f32
    %81 = vector.broadcast %cst_42 : f32 to vector<16x128xf32>
    %82 = arith.maximumf %80, %81 : vector<16x128xf32>
    %83 = arith.subf %77, %82 : vector<16x128xf32>
    %84 = arith.mulf %9, %83 : vector<16x128xf32>
    %85 = arith.addf %82, %84 : vector<16x128xf32>
    %cst_43 = arith.constant 0.000000e+00 : f32
    %86 = vector.broadcast %cst_43 : f32 to vector<16x128xf32>
    %87 = arith.subf %86, %85 : vector<16x128xf32>
    %88 = arith.mulf %74, %87 : vector<16x128xf32>
    %89 = arith.addf %3, %88 : vector<16x128xf32>
    %90 = arith.addf %3, %74 : vector<16x128xf32>
    %c1_i32_44 = arith.constant 1 : i32
    %c0_45 = arith.constant 0 : index
    %c0_46 = arith.constant 0 : index
    %91 = vector.load %arg7[%c0_45, %c0_46] : memref<16x128xf32, #tpu.memory_space<vmem>>, vector<16x128xf32>
    %92 = arith.addf %91, %89 : vector<16x128xf32>
    %c0_47 = arith.constant 0 : index
    %c0_48 = arith.constant 0 : index
    %93 = vector.load %arg7[%c0_47, %c0_48] : memref<16x128xf32, #tpu.memory_space<vmem>>, vector<16x128xf32>
    tpu.vector_store %arg7[%c0_47, %c0_48], %92 {strides = array<i32>} : memref<16x128xf32, #tpu.memory_space<vmem>>, vector<16x128xf32>,
    %c0_49 = arith.constant 0 : index
    %c0_50 = arith.constant 0 : index
    %94 = vector.load %arg8[%c0_49, %c0_50] : memref<16x128xf32, #tpu.memory_space<vmem>>, vector<16x128xf32>
    %95 = arith.addf %94, %90 : vector<16x128xf32>
    %c0_51 = arith.constant 0 : index
    %c0_52 = arith.constant 0 : index
    %96 = vector.load %arg8[%c0_51, %c0_52] : memref<16x128xf32, #tpu.memory_space<vmem>>, vector<16x128xf32>
    tpu.vector_store %arg8[%c0_51, %c0_52], %95 {strides = array<i32>} : memref<16x128xf32, #tpu.memory_space<vmem>>, vector<16x128xf32>,
    %c0_i32_53 = arith.constant 0 : i32
    %97 = arith.cmpi eq, %arg1, %c0_i32_53 : i32
    %98 = arith.extui %97 : i1 to i32
    %c0_i32_54 = arith.constant 0 : i32
    %99 = arith.cmpi ne, %98, %c0_i32_54 : i32
    scf.if %99 {
      %cst_55 = arith.constant 0.000000e+00 : f32
      %100 = vector.broadcast %cst_55 : f32 to vector<1x8x128xf32>
      %c0_56 = arith.constant 0 : index
      %c0_57 = arith.constant 0 : index
      %101 = vector.load %arg7[%c0_56, %c0_57] : memref<16x128xf32, #tpu.memory_space<vmem>>, vector<16x128xf32>
      %102 = vector.shape_cast %101 : vector<16x128xf32> to vector<1x16x128xf32>
      %cst_58 = arith.constant dense<0.000000e+00> : vector<1xf32>
      %103 = vector.multi_reduction <add>, %102, %cst_58 [1, 2] : vector<1x16x128xf32> to vector<1xf32>
      %104 = vector.shape_cast %103 : vector<1xf32> to vector<1x1x1xf32>
      %105 = vector.extract %104[0, 0, 0] : f32 from vector<1x1x1xf32>
      %106 = vector.broadcast %105 : f32 to vector<1x8x128xf32>
      %107 = arith.addf %100, %106 : vector<1x8x128xf32>
      %c0_59 = arith.constant 0 : index
      %c0_60 = arith.constant 0 : index
      %c0_61 = arith.constant 0 : index
      %108 = vector.load %arg4[%c0_59, %c0_60, %c0_61] : memref<1x8x128xf32, #tpu.memory_space<vmem>>, vector<1x8x128xf32>
      tpu.vector_store %arg4[%c0_59, %c0_60, %c0_61], %107 {strides = array<i32>} : memref<1x8x128xf32, #tpu.memory_space<vmem>>, vector<1x8x128xf32>,
      %cst_62 = arith.constant 0.000000e+00 : f32
      %109 = vector.broadcast %cst_62 : f32 to vector<1x8x128xf32>
      %c0_63 = arith.constant 0 : index
      %c0_64 = arith.constant 0 : index
      %110 = vector.load %arg8[%c0_63, %c0_64] : memref<16x128xf32, #tpu.memory_space<vmem>>, vector<16x128xf32>
      %111 = vector.shape_cast %110 : vector<16x128xf32> to vector<1x16x128xf32>
      %cst_65 = arith.constant dense<0.000000e+00> : vector<1xf32>
      %112 = vector.multi_reduction <add>, %111, %cst_65 [1, 2] : vector<1x16x128xf32> to vector<1xf32>
      %113 = vector.shape_cast %112 : vector<1xf32> to vector<1x1x1xf32>
      %114 = vector.extract %113[0, 0, 0] : f32 from vector<1x1x1xf32>
      %115 = vector.broadcast %114 : f32 to vector<1x8x128xf32>
      %116 = arith.addf %109, %115 : vector<1x8x128xf32>
      %c0_66 = arith.constant 0 : index
      %c0_67 = arith.constant 0 : index
      %c0_68 = arith.constant 0 : index
      %117 = vector.load %arg5[%c0_66, %c0_67, %c0_68] : memref<1x8x128xf32, #tpu.memory_space<vmem>>, vector<1x8x128xf32>
      tpu.vector_store %arg5[%c0_66, %c0_67, %c0_68], %116 {strides = array<i32>} : memref<1x8x128xf32, #tpu.memory_space<vmem>>, vector<1x8x128xf32>,
    } else {
    }
    return
  }
  func.func @transform_0(%arg0: i32, %arg1: i32) -> (i32, i32, i32) {
    %c1_i32 = arith.constant 1 : i32
    %0 = arith.muli %arg0, %c1_i32 : i32
    %1 = arith.addi %0, %arg1 : i32
    %c0_i32 = arith.constant 0 : i32
    %c0_i32_0 = arith.constant 0 : i32
    %c0_i32_1 = arith.constant 0 : i32
    return %1, %c0_i32, %c0_i32_0 : i32, i32, i32
  }
  func.func @transform_1(%arg0: i32, %arg1: i32) -> (i32, i32, i32) {
    %c1_i32 = arith.constant 1 : i32
    %0 = arith.muli %arg0, %c1_i32 : i32
    %1 = arith.addi %0, %arg1 : i32
    %c0_i32 = arith.constant 0 : i32
    %c0_i32_0 = arith.constant 0 : i32
    %c0_i32_1 = arith.constant 0 : i32
    return %1, %c0_i32, %c0_i32_0 : i32, i32, i32
  }
  func.func @transform_2(%arg0: i32, %arg1: i32) -> (i32, i32, i32) {
    %c0_i32 = arith.constant 0 : i32
    %c0_i32_0 = arith.constant 0 : i32
    %c0_i32_1 = arith.constant 0 : i32
    return %arg0, %c0_i32, %c0_i32_0 : i32, i32, i32
  }
  func.func @transform_3(%arg0: i32, %arg1: i32) -> (i32, i32, i32) {
    %c0_i32 = arith.constant 0 : i32
    %c0_i32_0 = arith.constant 0 : i32
    %c0_i32_1 = arith.constant 0 : i32
    return %arg0, %c0_i32, %c0_i32_0 : i32, i32, i32
  }
}

</mosaic_0001>

<bundles_post_ra>
// kernel: tpu_custom_call.1
= control target key start
LH: loop header
LB: loop body
LE: loop exit
PB: predicated region body
PF: predicated region fallthrough
CT: control target
= control target key end

     0   :  { %9 = vsyncpa [#allocation6], 0  ;;  %s816_s0 = inlined_call_operand.hbm [shape: f32[1,16,128], index: 0, kind: input, shape index: {}]   ;;  %s817_s1 = inlined_call_operand.hbm [shape: f32[1,16,128], index: 1, kind: input, shape index: {}]   ;;  %s818_s2 = inlined_call_operand.hbm [shape: f32[1,8,128], index: 2, kind: output, shape index: {0}]   ;;  %s819_s3 = inlined_call_operand.hbm [shape: f32[1,8,128], index: 3, kind: output, shape index: {1}]  }
   0x1   :  { %10 = vsyncpa [#allocation9], 0 }
   0x2   :  { %11 = vsyncpa [#allocation7], 0 }
   0x3   :  { %12 = vsyncpa [#allocation12], 0  ;;  %s21_s14 = sshll.u32 %s816_s0, 4  ;;  %s588_s15 = smov [#allocation5]   ;;  %s22_s14 = int_to_ptr.hbm [resolvable:$true] %s21_s14 }
   0x4   :  { %s23_s16 = sshll.u32 %s588_s15, 4  ;;  %s38_s19 = sshll.u32 %s817_s1, 4  ;;  %s24_s16 = int_to_ptr.vmem [resolvable:$true] %s23_s16  ;;  %s39_s19 = int_to_ptr.hbm [resolvable:$true] %s38_s19 }
   0x5   :  { %s589_s20 = smov 128   ;;  %s590_s21 = smov 8  }
   0x6   :  { %29 = dma.hbm_to_vmem [thread:$0]  %s22_s14, 256, %s24_s16, [#allocation6], %s589_s20, %s589_s20, %s590_s21  }
   0x7   :  { %s591_s22 = smov [#allocation8]  }
   0x8   :  { %s40_s23 = sshll.u32 %s591_s22, 4  ;;  %s41_s23 = int_to_ptr.vmem [resolvable:$true] %s40_s23 }
   0x9   :  { %46 = dma.hbm_to_vmem [thread:$0]  %s39_s19, 256, %s41_s23, [#allocation9], %s589_s20, %s589_s20, %s590_s21  }
   0xa   :  { %580 = dma.done.wait [#allocation6], 256  }
   0xb   :  { %581 = vsyncadd [#allocation6], 4294967040 }
   0xc   :  { %582 = dma.done.wait [#allocation9], 256  }
   0xd   :  { %583 = vsyncadd [#allocation9], 4294967040  ;;  %v65_v0 = vlaneseq  ;;  %v627_v4 = vld [vmem:[#allocation5] sm:$0xff]  ;;  %s592_s0 = smov 127   ;;  %s593_s1 = smov 1   ;;  %v631_v9 = vld [vmem:[#allocation5 + $0x8] sm:$0xff] }
   0xe   :  { %209 = vrot.lane.b32.xlu1 %v627_v4, %s592_s0  ;;  %220 = vrot.lane.b32.xlu2 %v627_v4, %s593_s1  ;;  %s594_s24 = smov 126   ;;  %s595_s25 = smov 2   ;;  %v596_v23 = vmov -1e+30   ;;  %476 = vlog2.f32 %v627_v4 }
   0xf   :  { %v66_v1 = vand.u32 127, %v65_v0  ;;  %v674_v56 = vshrl.u32 %v65_v0, 7  ;;  %478 = vlog2.f32 %v631_v9  ;;  %s598_s26 = smov [#allocation10]   ;;  %s424_s30 = sshll.u32 %s818_s2, 4  ;;  %s425_s30 = int_to_ptr.hbm [resolvable:$true] %s424_s30 }
  0x10   :  { %s422_s27 = sshll.u32 %s598_s26, 4  ;;  %s599_s4 = smov [#allocation11]   ;;  %s423_s27 = int_to_ptr.vmem [resolvable:$true] %s422_s27 }
  0x11   :  { %v67_v2 = vcvt.s32.f32 %v66_v1  ;;  %v70_v57 = vadd.s32 8, %v674_v56  ;;  %v678_v58 = vcvt.s32.f32 %v674_v56  ;;  %s433_s5 = sshll.u32 %s599_s4, 4  ;;  %s435_s8 = sshll.u32 %s819_s3, 4  ;;  %s434_s5 = int_to_ptr.vmem [resolvable:$true] %s433_s5  ;;  %s436_s8 = int_to_ptr.hbm [resolvable:$true] %s435_s8 }
  0x13   :  { %vm73_vm0 = vcmp.ge.f32.partialorder %v67_v2, 16.0  ;;  %v451_v3 = vadd.f32 -16.0, %v67_v2  ;;  %v680_v59 = vcvt.s32.f32 %v70_v57  ;;  %v94_v60 = vrot.slane %v678_v58, 7 }
  0x14   :  { %v111_v62 = vrot.slane %v678_v58, 1 }
  0x15   :  { %v75_v5 = vsel %vm73_vm0, %v451_v3, %v67_v2  ;;  %v95_v61 = vrot.slane %v680_v59, 7  ;;  %v112_v63 = vrot.slane %v680_v59, 1 }
  0x16   :  { %vm76_vm1 = vcmp.ge.f32.partialorder %v75_v5, 16.0  ;;  %v452_v6 = vadd.f32 -16.0, %v75_v5  ;;  %211 = vrot.lane.b32.xlu1 %v631_v9, %s592_s0  ;;  %222 = vrot.lane.b32.xlu2 %v631_v9, %s593_s1 }
  0x18   :  { %v78_v7 = vsel %vm76_vm1, %v452_v6, %v75_v5 }
  0x19   :  { %vm79_vm2 = vcmp.ge.f32.partialorder %v78_v7, 16.0  ;;  %v453_v8 = vadd.f32 -16.0, %v78_v7 }
  0x1b   :  { %v81_v10 = vsel %vm79_vm2, %v453_v8, %v78_v7 }
  0x1c   :  { %vm82_vm3 = vcmp.ge.f32.partialorder %v81_v10, 16.0  ;;  %v454_v11 = vadd.f32 -16.0, %v81_v10 }
  0x1e   :  { %v84_v12 = vsel %vm82_vm3, %v454_v11, %v81_v10  ;;  %vm96_vm3 = vcmp.lt.s32.totalorder %v674_v56, 1  ;;  %v350_v10 = vsub.f32 1.0, %v627_v4  ;;  %v129_v11 = vrot.slane %v678_v58, 6 }
  0x1f   :  { %vm85_vm4 = vcmp.ge.f32.partialorder %v84_v12, 16.0  ;;  %v455_v13 = vadd.f32 -16.0, %v84_v12  ;;  %v98_v0 = vsel %vm96_vm3, %v95_v61, %v94_v60  ;;  %v97_v2 = vsel %vm96_vm3, %v94_v60, %v95_v61 }
  0x20   :  { %v99_v5 = vsub.f32 %v98_v0, %v678_v58  ;;  %v100_v6 = vsub.f32 %v97_v2, %v680_v59  ;;  %480 = vlog2.f32 %v350_v10 }
  0x21   :  { %v87_v14 = vsel %vm85_vm4, %v455_v13, %v84_v12  ;;  %vm113_vm4 = vcmp.lt.s32.totalorder %v674_v56, 7  ;;  %v130_v12 = vrot.slane %v680_v59, 6  ;;  %v351_v13 = vsub.f32 1.0, %v631_v9 }
  0x22   :  { %vm88_vm5 = vcmp.ge.f32.partialorder %v87_v14, 16.0  ;;  %v456_v15 = vadd.f32 -16.0, %v87_v14  ;;  %v114_v3 = vsel %vm113_vm4, %v111_v62, %v112_v63  ;;  %v115_v7 = vsel %vm113_vm4, %v112_v63, %v111_v62 }
  0x23   :  { %v116_v8 = vsub.f32 %v114_v3, %v678_v58  ;;  %482 = vlog2.f32 %v351_v13 }
  0x24   :  { %v90_v16 = vsel %vm88_vm5, %v456_v15, %v87_v14  ;;  %vm101_vm5 = vcmp.eq.f32.partialorder %v99_v5, 1.0  ;;  %v117_v14 = vsub.f32 %v115_v7, %v680_v59 }
  0x25   :  { %vm91_vm6 = vcmp.ge.f32.partialorder %v90_v16, 16.0  ;;  %v457_v17 = vadd.f32 -16.0, %v90_v16 }
  0x27   :  { %v93_v18 = vsel %vm91_vm6, %v457_v17, %v90_v16  ;;  %vm131_vm6 = vcmp.lt.s32.totalorder %v674_v56, 2 }
  0x28   :  { %165 = vrot.lane.b32.xlu0 %v93_v18, %s593_s1  ;;  %195 = vrot.lane.b32.xlu1 %v93_v18, %s594_s24  ;;  %v133_v17 = vsel %vm131_vm6, %v130_v12, %v129_v11 }
  0x30   :  { %175 = vrot.lane.b32.xlu0 %v93_v18, %s592_s0 }
  0x38   :  { %185 = vrot.lane.b32.xlu0 %v93_v18, %s595_s25 }
  0x68   :  { %v221_v22 = vpop.permute.xlu2 %220 }
  0x70   :  { %v223_v35 = vpop.permute.xlu2 %222 }
  0x80   :  { %v210_v21 = vpop.permute.xlu1 %209 }
  0x88   :  { %v212_v29 = vpop.permute.xlu1 %211 }
  0x9a   :  { %v166_v19 = vpop.permute.xlu0 %165  ;;  %v196_v38 = vpop.permute.xlu1 %195 }
  0x9b   :  { %v167_v20 = vsub.f32 %v166_v19, %v93_v18  ;;  %v197_v39 = vsub.f32 %v196_v38, %v93_v18  ;;  %v148_v19 = vrot.slane %v680_v59, 2 }
  0x9d   :  { %vm168_vm7 = vcmp.eq.f32.partialorder %v167_v20, 1.0  ;;  %vm169_vm8 = vcmp.eq.f32.partialorder %v167_v20, -1.0  ;;  %vm198_vm13 = vcmp.eq.f32.partialorder %v197_v39, 2.0  ;;  %vm199_vm14 = vcmp.eq.f32.partialorder %v197_v39, -2.0 }
  0x9e   :  { %vm170_vm9 = vmor %vm168_vm7, %vm169_vm8  ;;  %vm102_vm7 = vcmp.eq.f32.partialorder %v100_v6, 1.0  ;;  %vm103_vm8 = vcmp.eq.f32.partialorder %v99_v5, -1.0 }
  0x9f   :  { %v171_v24 = vsel %vm170_vm9, 0.0, %v596_v23  ;;  %vm200_vm15 = vmor %vm198_vm13, %vm199_vm14  ;;  %vm104_vm9 = vcmp.eq.f32.partialorder %v100_v6, -1.0  ;;  %vm149_vm13 = vcmp.lt.s32.totalorder %v674_v56, 6 }
  0xa0   :  { %v227_v25 = vadd.f32 %v221_v22, %v171_v24  ;;  %v228_v36 = vadd.f32 %v223_v35, %v171_v24  ;;  %v648_v42 = vsel %vm200_vm15, 0.0, %v596_v23  ;;  %vm720_vm14 = vmor %vm102_vm7, %vm104_vm9 }
  0xa2   :  { %v176_v26 = vpop.permute.xlu0 %175  ;;  %v229_v27 = vmax.f32 %v627_v4, %v227_v25  ;;  %v230_v37 = vmax.f32 %v631_v9, %v228_v36  ;;  %v477_v25 = vpop.eup %476 }
  0xa3   :  { %v177_v28 = vsub.f32 %v176_v26, %v93_v18 }
  0xa4   :  { %242 = vrot.lane.b32.xlu1 %v229_v27, %s595_s25 }
  0xa5   :  { %vm178_vm10 = vcmp.eq.f32.partialorder %v177_v28, 1.0  ;;  %vm179_vm11 = vcmp.eq.f32.partialorder %v177_v28, -1.0  ;;  %v132_v28 = vsel %vm131_vm6, %v129_v11, %v130_v12 }
  0xa6   :  { %vm180_vm12 = vmor %vm178_vm10, %vm179_vm11  ;;  %vm118_vm10 = vcmp.eq.f32.partialorder %v116_v8, 1.0  ;;  %vm120_vm11 = vcmp.eq.f32.partialorder %v116_v8, -1.0 }
  0xa7   :  { %v181_v30 = vsel %vm180_vm12, 0.0, %v596_v23  ;;  %vm714_vm12 = vmor %vm101_vm5, %vm103_vm8 }
  0xa8   :  { %v216_v31 = vadd.f32 %v210_v21, %v181_v30  ;;  %v217_v32 = vadd.f32 %v212_v29, %v181_v30  ;;  %vm725_vm15 = vmor %vm118_vm10, %vm120_vm11  ;;  %v134_v29 = vsub.f32 %v133_v17, %v678_v58  ;;  %v479_v30 = vpop.eup %478  ;;  %v107_v36 = vsel %vm714_vm12, 0.0, %v596_v23 }
  0xaa   :  { %v219_v33 = vmax.f32 %v631_v9, %v217_v32  ;;  %v218_v34 = vmax.f32 %v627_v4, %v216_v31  ;;  %v186_v40 = vpop.permute.xlu0 %185  ;;  %vm136_vm5 = vcmp.eq.f32.partialorder %v134_v29, 2.0  ;;  %vm138_vm7 = vcmp.eq.f32.partialorder %v134_v29, -2.0 }
  0xab   :  { %v187_v41 = vsub.f32 %v186_v40, %v93_v18  ;;  %v147_v18 = vrot.slane %v678_v58, 2  ;;  %v108_v40 = vsel %vm720_vm14, 0.0, %v596_v23  ;;  %vm760_vm12 = vmor %vm136_vm5, %vm138_vm7 }
  0xac   :  { %231 = vrot.lane.b32.xlu2 %v218_v34, %s594_s24  ;;  %233 = vrot.lane.b32.xlu0 %v219_v33, %s594_s24  ;;  %v142_v12 = vsel %vm760_vm12, 0.0, %v596_v23 }
  0xad   :  { %vm188_vm0 = vcmp.eq.f32.partialorder %v187_v41, 2.0  ;;  %vm189_vm1 = vcmp.eq.f32.partialorder %v187_v41, -2.0  ;;  %v150_v32 = vsel %vm149_vm13, %v147_v18, %v148_v19  ;;  %v124_v41 = vsel %vm725_vm15, 0.0, %v596_v23 }
  0xae   :  { %vm190_vm2 = vmor %vm188_vm0, %vm189_vm1  ;;  %vm119_vm0 = vcmp.eq.f32.partialorder %v117_v14, 1.0  ;;  %vm121_vm1 = vcmp.eq.f32.partialorder %v117_v14, -1.0 }
  0xaf   :  { %v656_v46 = vsel %vm190_vm2, 0.0, %v596_v23  ;;  %vm123_vm2 = vmor %vm119_vm0, %vm121_vm1 }
  0xb4   :  { %244 = vrot.lane.b32.xlu2 %v230_v37, %s595_s25 }
 0x106   :  { %v232_v43 = vpop.permute.xlu2 %231 }
 0x107   :  { %v238_v44 = vadd.f32 %v232_v43, %v648_v42  ;;  %v135_v43 = vsub.f32 %v132_v28, %v680_v59  ;;  %v208_v28 = vld [vmem:[#allocation8 + $0x8] sm:$0xff] }
 0x109   :  { %v651_v45 = vmax.f32 %v218_v34, %v238_v44  ;;  %vm137_vm8 = vcmp.eq.f32.partialorder %v135_v43, 2.0  ;;  %vm139_vm9 = vcmp.eq.f32.partialorder %v135_v43, -2.0 }
 0x10a   :  { %vm764_vm0 = vmor %vm137_vm8, %vm139_vm9 }
 0x10b   :  { %253 = vrot.lane.b32.xlu0 %v651_v45, %s594_s24  ;;  %v143_v13 = vsel %vm764_vm0, 0.0, %v596_v23 }
 0x10e   :  { %v245_v47 = vpop.permute.xlu2 %244 }
 0x10f   :  { %v250_v48 = vadd.f32 %v245_v47, %v656_v46 }
 0x111   :  { %v659_v49 = vmax.f32 %v230_v37, %v250_v48  ;;  %v151_v37 = vsel %vm149_vm13, %v148_v19, %v147_v18  ;;  %v345_v48 = vmul.f32 0.6931472, %v477_v25 }
 0x112   :  { %v153_v47 = vsub.f32 %v151_v37, %v680_v59 }
 0x113   :  { %263 = vrot.lane.b32.xlu0 %v659_v49, %s595_s25  ;;  %v348_v61 = vmax.f32 %v345_v48, -100.0 }
 0x114   :  { %vm155_vm14 = vcmp.eq.f32.partialorder %v153_v47, 2.0  ;;  %vm157_vm15 = vcmp.eq.f32.partialorder %v153_v47, -2.0 }
 0x116   :  { %v243_v50 = vpop.permute.xlu1 %242 }
 0x117   :  { %v249_v51 = vadd.f32 %v243_v50, %v656_v46  ;;  %v347_v50 = vmul.f32 0.6931472, %v479_v30 }
 0x119   :  { %v664_v52 = vmax.f32 %v229_v27, %v249_v51  ;;  %v349_v62 = vmax.f32 %v347_v50, -100.0  ;;  %v207_v27 = vld [vmem:[#allocation8] sm:$0xff] }
 0x11b   :  { %261 = vrot.lane.b32.xlu2 %v664_v52, %s595_s25 }
 0x11e   :  { %v234_v53 = vpop.permute.xlu0 %233 }
 0x11f   :  { %v239_v54 = vadd.f32 %v234_v53, %v648_v42 }
 0x121   :  { %v669_v55 = vmax.f32 %v219_v33, %v239_v54  ;;  %v481_v33 = vpop.eup %480  ;;  %v125_v54 = vsel %vm123_vm2, 0.0, %v596_v23  ;;  %vm159_vm2 = vmor %vm155_vm14, %vm157_vm15 }
 0x122   :  { %v483_v38 = vpop.eup %482  ;;  %v753_v51 = vmul.f32 0.6931472, %v481_v33  ;;  %v161_v19 = vsel %vm159_vm2, 0.0, %v596_v23 }
 0x123   :  { %255 = vrot.lane.b32.xlu1 %v669_v55, %s594_s24 }
 0x124   :  { %v356_v63 = vmax.f32 %v753_v51, -100.0 }
 0x175   :  { %v262_v15 = vpop.permute.xlu2 %261 }
 0x176   :  { %v265_v20 = vadd.f32 %v262_v15, %v656_v46 }
 0x178   :  { %v267_v34 = vmax.f32 %v664_v52, %v265_v20  ;;  %v755_v52 = vmul.f32 0.6931472, %v483_v38  ;;  %v358_v20 = vsub.f32 %v348_v61, %v356_v63 }
 0x17a   :  { %v357_v0 = vmax.f32 %v755_v52, -100.0 }
 0x17d   :  { %v254_v1 = vpop.permute.xlu0 %253 }
 0x17e   :  { %v257_v16 = vadd.f32 %v254_v1, %v648_v42  ;;  %v597_v1 = vmov 0.0  }
 0x180   :  { %v259_v26 = vmax.f32 %v651_v45, %v257_v16  ;;  %v152_v45 = vsub.f32 %v150_v32, %v678_v58 }
 0x182   :  { %v269_v44 = vmax.f32 %v259_v26, %v267_v34  ;;  %vm154_vm10 = vcmp.eq.f32.partialorder %v152_v45, 2.0  ;;  %vm156_vm11 = vcmp.eq.f32.partialorder %v152_v45, -2.0 }
 0x183   :  { %vm770_vm1 = vmor %vm154_vm10, %vm156_vm11 }
 0x184   :  { %v271_v57 = vrot.slane %v269_v44, 1  ;;  %v285_v60 = vrot.slane %v269_v44, 7  ;;  %v160_v18 = vsel %vm770_vm1, 0.0, %v596_v23 }
 0x185   :  { %v264_v21 = vpop.permute.xlu0 %263 }
 0x186   :  { %v266_v31 = vadd.f32 %v264_v21, %v656_v46  ;;  %v359_v21 = vsub.f32 %v349_v62, %v357_v0 }
 0x188   :  { %v268_v46 = vmax.f32 %v659_v49, %v266_v31  ;;  %v361_v37 = vmul.f32 %v359_v21, %v208_v28 }
 0x18a   :  { %v363_v47 = vadd.f32 %v361_v37, %v357_v0 }
 0x18c   :  { %v365_v0 = vsub.f32 0.0, %v363_v47 }
 0x195   :  { %v256_v35 = vpop.permute.xlu1 %255 }
 0x196   :  { %v258_v39 = vadd.f32 %v256_v35, %v648_v42 }
 0x198   :  { %v260_v42 = vmax.f32 %v669_v55, %v258_v39 }
 0x19a   :  { %v270_v53 = vmax.f32 %v260_v42, %v268_v46 }
 0x19c   :  { %v272_v49 = vrot.slane %v270_v53, 1  ;;  %v286_v58 = vrot.slane %v270_v53, 7 }
 0x19e   :  { %v276_v2 = vsel %vm113_vm4, %v271_v57, %v272_v49  ;;  %v277_v3 = vsel %vm113_vm4, %v272_v49, %v271_v57  ;;  %v288_v5 = vsel %vm96_vm3, %v285_v60, %v286_v58  ;;  %v289_v6 = vsel %vm96_vm3, %v286_v58, %v285_v60 }
 0x19f   :  { %v281_v7 = vadd.f32 %v276_v2, %v124_v41  ;;  %v282_v8 = vadd.f32 %v277_v3, %v125_v54  ;;  %v292_v10 = vadd.f32 %v289_v6, %v107_v36  ;;  %v293_v11 = vadd.f32 %v288_v5, %v108_v40 }
 0x1a0   :  { %v360_v36 = vmul.f32 %v358_v20, %v207_v27 }
 0x1a1   :  { %v283_v14 = vmax.f32 %v269_v44, %v281_v7  ;;  %v284_v15 = vmax.f32 %v270_v53, %v282_v8  ;;  %v294_v16 = vmax.f32 %v269_v44, %v292_v10  ;;  %v295_v17 = vmax.f32 %v270_v53, %v293_v11 }
 0x1a2   :  { %v362_v42 = vadd.f32 %v360_v36, %v356_v63 }
 0x1a3   :  { %v296_v22 = vrot.slane %v283_v14, 2  ;;  %v297_v24 = vrot.slane %v284_v15, 2  ;;  %v308_v25 = vrot.slane %v294_v16, 6  ;;  %v309_v26 = vrot.slane %v295_v17, 6 }
 0x1a4   :  { %v364_v63 = vsub.f32 0.0, %v362_v42 }
 0x1a5   :  { %v299_v29 = vsel %vm149_vm13, %v296_v22, %v297_v24  ;;  %v300_v30 = vsel %vm149_vm13, %v297_v24, %v296_v22  ;;  %v311_v31 = vsel %vm131_vm6, %v308_v25, %v309_v26  ;;  %v312_v23 = vsel %vm131_vm6, %v309_v26, %v308_v25 }
 0x1a6   :  { %v304_v32 = vadd.f32 %v299_v29, %v160_v18  ;;  %v305_v33 = vadd.f32 %v300_v30, %v161_v19  ;;  %v316_v34 = vadd.f32 %v312_v23, %v142_v12  ;;  %v317_v35 = vadd.f32 %v311_v31, %v143_v13 }
 0x1a8   :  { %v306_v38 = vmax.f32 %v283_v14, %v304_v32  ;;  %v307_v39 = vmax.f32 %v284_v15, %v305_v33  ;;  %v318_v40 = vmax.f32 %v294_v16, %v316_v34  ;;  %v319_v41 = vmax.f32 %v295_v17, %v317_v35 }
 0x1aa   :  { %v320_v43 = vrot.slane %v306_v38, 2  ;;  %v321_v44 = vrot.slane %v307_v39, 2  ;;  %v328_v45 = vrot.slane %v318_v40, 6  ;;  %v329_v46 = vrot.slane %v319_v41, 6 }
 0x1ac   :  { %v322_v48 = vsel %vm149_vm13, %v320_v43, %v321_v44  ;;  %v323_v50 = vsel %vm149_vm13, %v321_v44, %v320_v43  ;;  %v330_v51 = vsel %vm131_vm6, %v328_v45, %v329_v46  ;;  %v331_v52 = vsel %vm131_vm6, %v329_v46, %v328_v45 }
 0x1ad   :  { %v324_v53 = vadd.f32 %v322_v48, %v160_v18  ;;  %v325_v54 = vadd.f32 %v323_v50, %v161_v19  ;;  %v332_v57 = vadd.f32 %v331_v52, %v142_v12  ;;  %v333_v60 = vadd.f32 %v330_v51, %v143_v13 }
 0x1af   :  { %v326_v49 = vmax.f32 %v306_v38, %v324_v53  ;;  %v327_v58 = vmax.f32 %v307_v39, %v325_v54  ;;  %v334_v55 = vmax.f32 %v318_v40, %v332_v57  ;;  %v335_v59 = vmax.f32 %v319_v41, %v333_v60 }
 0x1b1   :  { %v336_v61 = vmax.f32 %v326_v49, %v334_v55  ;;  %v337_v62 = vmax.f32 %v327_v58, %v335_v59 }
 0x1b3   :  { %vm338_vm3 = vcmp.eq.f32.partialorder %v336_v61, %v627_v4  ;;  %vm339_vm4 = vcmp.eq.f32.partialorder %v337_v62, %v631_v9 }
 0x1b4   :  { %v458_v2 = vsel %vm338_vm3, 1.0, %v597_v1  ;;  %v459_v56 = vsel %vm339_vm4, 1.0, %v597_v1 }
 0x1b5   :  { %v404_v3 = vadd.f32 %v459_v56, %v458_v2  ;;  %v366_v5 = vmul.f32 %v458_v2, %v364_v63  ;;  %v367_v6 = vmul.f32 %v459_v56, %v365_v0 }
 0x1b7   :  { %405 = vadd.xlane.f32.xlu2 %v404_v3  ;;  %v389_v7 = vadd.f32 %v367_v6, %v366_v5 }
 0x1b9   :  { %390 = vadd.xlane.f32.xlu1 %v389_v7 }
 0x22a   :  { %v406_v8 = vpop.xlane.xlu2 %405 }
 0x22b   :  { %v407_v10 = vrot.slane %v406_v8, 4 }
 0x22c   :  { %v391_v11 = vpop.xlane.xlu1 %390 }
 0x22d   :  { %v408_v12 = vadd.f32 %v407_v10, %v406_v8  ;;  %v392_v13 = vrot.slane %v391_v11, 4 }
 0x22f   :  { %v409_v14 = vrot.slane %v408_v12, 2  ;;  %v393_v15 = vadd.f32 %v392_v13, %v391_v11 }
 0x231   :  { %v410_v16 = vadd.f32 %v409_v14, %v408_v12  ;;  %v394_v4 = vrot.slane %v393_v15, 2 }
 0x233   :  { %v395_v17 = vadd.f32 %v394_v4, %v393_v15  ;;  %v411_v9 = vrot.slane %v410_v16, 1 }
 0x235   :  { %v396_v18 = vrot.slane %v395_v17, 1  ;;  %v412_v20 = vadd.f32 %v411_v9, %v410_v16 }
 0x237   :  { %v397_v19 = vadd.f32 %v396_v18, %v395_v17 }
 0x239   :  { %460 = vpush %v397_v19 }
 0x23a   :  { %462 = vpush %v412_v20 }
 0x26a   :  { %s461_s9 = spop %460 }
 0x26b   :  { %v399_v21 = vstv %s461_s9  ;;  %s463_s10 = spop %462 }
 0x26c   :  { %401 = vst [vmem:[#allocation10] sm:$0xff] %v399_v21  ;;  %v414_v22 = vstv %s463_s10 }
 0x26d   :  { %416 = vst [vmem:[#allocation11] sm:$0xff] %v414_v22  ;;  %427 = dma.vmem_to_hbm [thread:$0]  %s423_s27, 128, %s425_s30, [#allocation7]  }
 0x26e   :  { %438 = dma.vmem_to_hbm [thread:$0]  %s434_s5, 128, %s436_s8, [#allocation12]  }
 0x26f   :  { %584 = dma.done.wait [#allocation7], 128  }
 0x270   :  { %585 = vsyncadd [#allocation7], 4294967168 }
 0x271   :  { %586 = dma.done.wait [#allocation12], 128  }
 0x272   :  { %587 = vsyncadd [#allocation12], 4294967168 }
 0x273   :  { %447 = vsyncpa [#allocation6], 1 }
 0x274   :  { %448 = vsyncpa [#allocation9], 1 }
 0x275   :  { %449 = vsyncpa [#allocation7], 1 }
 0x276   :  { %450 = vsyncpa [#allocation12], 1 }

</bundles_post_ra>
